<compile_context>
chip_gen: v6e
topology: v6e:2x2x1
jax: 0.10.0
libtpu: 0.0.40
codegen_flags: <defaults>
</compile_context>

<pallas_src>
import numpy as np
import jax
import jax.numpy as jnp
from jax.experimental import pallas as pl
from jax.experimental.pallas import tpu as pltpu


def _div_kernel(x_ref, a_ref, b_ref, mk_ref, o_ref):
    """One block of `g` whole images, flattened to image rows.

    x_ref : (rows, 2*W)  interleaved (u, v) lane pairs, rows = g*H image rows
    a_ref : (2*W, W)     +u[., w-1] (w>=1) - u[., w] (w<W-1), lane-compacting
    b_ref : (2*W, W)     extracts v[., w] from the interleaved lanes
    mk_ref: (rows, 1)    1.0 except 0.0 on rows with h == H-1
    o_ref : (rows, W)
    """
    y = x_ref[...].astype(jnp.float32)

    # W-direction terms: de-interleave + lane shifts folded into the constant
    # matrix -> MXU (free while the kernel is HBM-bound).
    out = jnp.dot(y, a_ref[...], preferred_element_type=jnp.float32,
                  precision=jax.lax.Precision.HIGHEST)

    # H-direction terms: p[r, w] = v[h, w]; zero the last row of every image,
    # then a one-row sublane shift yields v[h-1, w] (zero at h == 0 because the
    # previous image's last row was zeroed / the block top is zero-padded).
    p = jnp.dot(y, b_ref[...], preferred_element_type=jnp.float32,
                precision=jax.lax.Precision.HIGHEST)
    q = p * mk_ref[...]
    q_up = jnp.concatenate([jnp.zeros_like(q[:1]), q[:-1]], axis=0)
    out = out + q_up - q

    o_ref[...] = out.astype(o_ref.dtype)


def _choose_group(N, H, W, esize, budget_bytes):
    """Images per block g (divides N).  Block rows = g*H must be 8-aligned (or
    the full array) and the per-block VMEM footprint must fit the budget."""
    W2 = 2 * W

    def footprint(g):
        rows = g * H
        return (rows * 2 * (W2 + W) * esize          # double-buffered in/out blocks
                + rows * (W2 + 5 * W) * 4            # f32 temporaries in the kernel
                + rows * 2 * 128 * 4                 # lane-padded mask block (2 bufs)
                + 4 * W2 * W * 4)                    # A, B (2 buffers each)

    divisors = [d for d in range(1, N + 1) if N % d == 0]
    aligned = [g for g in divisors if (g * H) % 8 == 0 or g == N]
    fitting = [g for g in aligned if footprint(g) <= budget_bytes]
    if not fitting:
        # TODO(synk): halo-split the H axis when a single image overflows VMEM.
        fitting = [min(aligned)]
    g = max(fitting)
    if N // g < 2:                        # prefer >= 2 grid steps (2 TCs on v7x)
        smaller = [d for d in fitting if N // d >= 2]
        if smaller:
            g = max(smaller)
    return g, footprint(g)


def div_pallas(x, *, vmem_budget_bytes=24 * 1024 * 1024):
    """Divergence of a 2-component field.  x: [B, C, H, W, 2] -> [B, C, H, W]."""
    B, C, H, W, two = x.shape
    assert two == 2, "last dim must hold the 2 vector components"
    N = B * C
    W2 = 2 * W
    esize = x.dtype.itemsize

    # Free contiguous reshape only -- no HBM transpose.
    x2 = x.reshape(N * H, W2)

    # Constant finite-difference / selection matrices (0 / +-1, built once).
    t = np.arange(W2).reshape(W2, 1)
    w = np.arange(W).reshape(1, W)
    a_mat = (((t == 2 * w - 2) & (w >= 1)).astype(np.float32)
             - ((t == 2 * w) & (w <= W - 2)).astype(np.float32))
    b_mat = (t == 2 * w + 1).astype(np.float32)
    # 1.0 everywhere except the last row of every image (h == H-1).
    m_keep = (np.arange(N * H) % H != H - 1).astype(np.float32).reshape(N * H, 1)

    g, fp = _choose_group(N, H, W, esize, vmem_budget_bytes)
    rows = g * H
    grid = (N // g,)

    cost = pl.CostEstimate(
        flops=int(8 * N * H * W * W + 6 * N * H * W),
        bytes_accessed=int(3 * N * H * W * esize + 8 * W2 * W),
        transcendentals=0,
    )

    out2 = pl.pallas_call(
        _div_kernel,
        out_shape=jax.ShapeDtypeStruct((N * H, W), x.dtype),
        grid=grid,
        in_specs=[
            pl.BlockSpec((rows, W2), lambda i: (i, 0)),
            pl.BlockSpec((W2, W), lambda i: (0, 0)),
            pl.BlockSpec((W2, W), lambda i: (0, 0)),
            pl.BlockSpec((rows, 1), lambda i: (i, 0)),
        ],
        out_specs=pl.BlockSpec((rows, W), lambda i: (i, 0)),
        compiler_params=pltpu.CompilerParams(
            dimension_semantics=("parallel",),
            vmem_limit_bytes=int(max(32 * 1024 * 1024,
                                     min(96 * 1024 * 1024, 2 * fp))),
        ),
        cost_estimate=cost,
    )(x2, jnp.asarray(a_mat), jnp.asarray(b_mat), jnp.asarray(m_keep))

    # Free reshape back to [B, C, H, W].
    return out2.reshape(B, C, H, W)


def div_ref(x):
    """Pure-JAX reference mirroring the PyTorch __matmul__ exactly."""
    div = jnp.zeros(x.shape[:-1], dtype=x.dtype)
    div = div.at[:, :, :, 1:].add(x[:, :, :, :-1, 0])
    div = div.at[:, :, :, :-1].add(-x[:, :, :, :-1, 0])
    div = div.at[:, :, 1:, :].add(x[:, :, :-1, :, 1])
    div = div.at[:, :, :-1, :].add(-x[:, :, :-1, :, 1])
    return div


if __name__ == "__main__":
    key = jax.random.PRNGKey(0)
    B, C, H, W = 2, 4, 16, 16
    x = jax.random.normal(key, (B, C, H, W, 2), dtype=jnp.float32)

    out = jax.jit(div_pallas)(x)
    jax.block_until_ready(out)

    ref = div_ref(x)
    assert out.shape == (B, C, H, W)
    assert jnp.allclose(out, ref, atol=1e-5, rtol=1e-5)

    print("KERNEL_OK")
</pallas_src>

<mosaic_0001>
module attributes {stable_mosaic.version = 11 : i64} {
  func.func @_div_kernel(%arg0: i32, %arg1: memref<64x32xf32, #tpu.memory_space<vmem>>, %arg2: memref<32x16xf32, #tpu.memory_space<vmem>>, %arg3: memref<32x16xf32, #tpu.memory_space<vmem>>, %arg4: memref<64x1xf32, #tpu.memory_space<vmem>>, %arg5: memref<64x16xf32, #tpu.memory_space<vmem>>) attributes {dimension_semantics = [#tpu.dimension_semantics<parallel>], iteration_bounds = array<i64: 2>, scalar_prefetch = 0 : i64, scratch_operands = 0 : i64, tpu.core_type = #tpu.core_type<tc>, window_params = [{transform_indices = @transform_0, window_bounds = array<i64: 64, 32>}, {pipeline_mode = #tpu.pipeline_mode<synchronous>, transform_indices = @transform_1, window_bounds = array<i64: 32, 16>}, {pipeline_mode = #tpu.pipeline_mode<synchronous>, transform_indices = @transform_2, window_bounds = array<i64: 32, 16>}, {transform_indices = @transform_3, window_bounds = array<i64: 64, 1>}, {transform_indices = @transform_4, window_bounds = array<i64: 64, 16>}]} {
    %c0 = arith.constant 0 : index
    %c0_0 = arith.constant 0 : index
    %0 = vector.load %arg1[%c0, %c0_0] : memref<64x32xf32, #tpu.memory_space<vmem>>, vector<64x32xf32>
    %c0_1 = arith.constant 0 : index
    %c0_2 = arith.constant 0 : index
    %1 = vector.load %arg2[%c0_1, %c0_2] : memref<32x16xf32, #tpu.memory_space<vmem>>, vector<32x16xf32>
    %cst = arith.constant dense<0.000000e+00> : vector<64x16xf32>
    %2 = tpu.matmul %0, %1, %cst {dimension_numbers = #tpu.dot_dimension_numbers<[1], [0], [0], [1], [0, 0, 1, 1], [], []>, precision = #tpu.contract_precision<fp32>} : vector<64x32xf32>, vector<32x16xf32>, vector<64x16xf32> -> vector<64x16xf32>
    %c0_3 = arith.constant 0 : index
    %c0_4 = arith.constant 0 : index
    %3 = vector.load %arg3[%c0_3, %c0_4] : memref<32x16xf32, #tpu.memory_space<vmem>>, vector<32x16xf32>
    %cst_5 = arith.constant dense<0.000000e+00> : vector<64x16xf32>
    %4 = tpu.matmul %0, %3, %cst_5 {dimension_numbers = #tpu.dot_dimension_numbers<[1], [0], [0], [1], [0, 0, 1, 1], [], []>, precision = #tpu.contract_precision<fp32>} : vector<64x32xf32>, vector<32x16xf32>, vector<64x16xf32> -> vector<64x16xf32>
    %c0_6 = arith.constant 0 : index
    %c0_7 = arith.constant 0 : index
    %5 = vector.load %arg4[%c0_6, %c0_7] : memref<64x1xf32, #tpu.memory_space<vmem>>, vector<64x1xf32>
    %6 = vector.broadcast %5 : vector<64x1xf32> to vector<64x16xf32>
    %7 = arith.mulf %4, %6 : vector<64x16xf32>
    %cst_8 = arith.constant 0.000000e+00 : f32
    %8 = vector.broadcast %cst_8 : f32 to vector<1x16xf32>
    %9 = vector.extract_strided_slice %7 {offsets = [0, 0], sizes = [63, 16], strides = [1, 1]} : vector<64x16xf32> to vector<63x16xf32>
    %10 = tpu.concatenate %8, %9 in 0 : vector<1x16xf32>, vector<63x16xf32> -> vector<64x16xf32>
    %11 = arith.addf %2, %10 : vector<64x16xf32>
    %12 = arith.subf %11, %7 : vector<64x16xf32>
    %c0_9 = arith.constant 0 : index
    %c0_10 = arith.constant 0 : index
    %13 = vector.load %arg5[%c0_9, %c0_10] : memref<64x16xf32, #tpu.memory_space<vmem>>, vector<64x16xf32>
    tpu.vector_store %arg5[%c0_9, %c0_10], %12 {strides = array<i32>} : memref<64x16xf32, #tpu.memory_space<vmem>>, vector<64x16xf32>,
    return
  }
  func.func @transform_0(%arg0: i32) -> (i32, i32) {
    %c0_i32 = arith.constant 0 : i32
    %c0_i32_0 = arith.constant 0 : i32
    return %arg0, %c0_i32 : i32, i32
  }
  func.func @transform_1(%arg0: i32) -> (i32, i32) {
    %c0_i32 = arith.constant 0 : i32
    %c0_i32_0 = arith.constant 0 : i32
    %c0_i32_1 = arith.constant 0 : i32
    return %c0_i32, %c0_i32_0 : i32, i32
  }
  func.func @transform_2(%arg0: i32) -> (i32, i32) {
    %c0_i32 = arith.constant 0 : i32
    %c0_i32_0 = arith.constant 0 : i32
    %c0_i32_1 = arith.constant 0 : i32
    return %c0_i32, %c0_i32_0 : i32, i32
  }
  func.func @transform_3(%arg0: i32) -> (i32, i32) {
    %c0_i32 = arith.constant 0 : i32
    %c0_i32_0 = arith.constant 0 : i32
    return %arg0, %c0_i32 : i32, i32
  }
  func.func @transform_4(%arg0: i32) -> (i32, i32) {
    %c0_i32 = arith.constant 0 : i32
    %c0_i32_0 = arith.constant 0 : i32
    return %arg0, %c0_i32 : i32, i32
  }
}

</mosaic_0001>

<bundles_post_ra>
// kernel: div_pallas.1
= control target key start
LH: loop header
LB: loop body
LE: loop exit
PB: predicated region body
PF: predicated region fallthrough
CT: control target
= control target key end

     0   :  { %9 = vsyncpa [#allocation3], 0  ;;  %s3201_s0 = inlined_call_operand.vmem [shape: f32[128,32], index: 0, kind: input, shape index: {}]   ;;  %s3202_s1 = inlined_call_operand.vmem [shape: f32[32,16], index: 1, kind: input, shape index: {}]   ;;  %s3203_s2 = inlined_call_operand.vmem [shape: f32[32,16], index: 2, kind: input, shape index: {}]   ;;  %s3204_s3 = inlined_call_operand.vmem [shape: f32[128,1], index: 3, kind: input, shape index: {}]   ;;  %s3205_s4 = inlined_call_operand.hbm [shape: f32[128,16], index: 4, kind: output, shape index: {}]  }
   0x1   :  { %11 = vsyncpa [#allocation3 + $0x1], 0  ;;  %s2562_s15 = smov 0   ;;  %s2564_s16 = smov 0  }
   0x2   :  { %s2566_s17 = smov 0   ;;  %s2568_s18 = smov 0  }
   0x3 LB: > { %s2583_s19 = sadd.s32 4294967295, %s2531_s18   ;;  %s2028_s20 = sadd.s32 4294967294, %s2531_s18   ;;  %s2531_s18 = sphi %s2568_s18, %s3211_s18   ;;  %s2527_s17 = sphi %s2566_s17, %s3210_s17   ;;  %s2523_s16 = sphi %s2564_s16, %s3209_s16   ;;  %s2519_s15 = sphi %s2562_s15, %s3208_s15  }
   0x4   : > { %s2587_s21 = sadd.s32 1, %s2531_s18   ;;  %s118_s22 = sadd.s32 1, %s2527_s17 }
   0x5   : > { %s115_s23 = ssub.s32 %s2531_s18, %s2587_s21  ;;  %p128_p0 = scmp.ne.s32.totalorder %s2527_s17, %s2523_s16 }
   0x6   : > { %p116_p1 = scmp.eq.s32.totalorder %s115_s23, 0  ;;  %p129_p2 = scmp.eq.s32.totalorder %s2583_s19, 1 }
   0x7   : > { %p134_p3 = scmp.ne.s32.totalorder %s2523_s16, %s2519_s15  ;;  %p135_p4 = scmp.eq.s32.totalorder %s2028_s20, 1 }
   0x8   : > { %s2598_s24 = scalar_select %p116_p1, %s2527_s17, %s118_s22  }
   0x9   : > { %p2600_p5 = por %p129_p2, %p128_p0  ;;  %p2604_p6 = por %p135_p4, %p134_p3 }
   0xa   : > { %p2031_p7 = scmp.ge.s32.totalorder %s2531_s18, 1  ;;  %p177_p8 = scmp.lt.s32.totalorder %s2531_s18, 3 }
   0xc   : > { %p178_p9 = pnand %p2031_p7, %p177_p8 }
   0xd   : > { %s2033_s7 = sshll.u32 (!%p178_p9), %s2583_s19, 3  ;;  %s205_s8 = sand.u32 (!%p178_p9), 1, %s2523_s16  }
   0xe   : > { %181 = sbr.rel (%p178_p9) target bundleno = 344 (0x158), region = 36  ;;  %p209_p10 = scmp.lt.s32.totalorder (!%p178_p9), %s2033_s7, 15 }
   0xf   : > { %s2032_s9 = sshll.u32 (!%p178_p9), %s205_s8, 6  ;;  %s2042_s11 = sshll.u32 (!%p178_p9), %s2583_s19, 10 }
  0x10   : > { %s3150_s20 = scalar_lea.hbm (!%p178_p9), %s3205_s4, %s2042_s11  ;;  %s3161_s19 = scalar_lea.sflag (!%p178_p9), [#allocation3], %s205_s8 }
  0x11   : > { %s2534_s23 = smov (!%p178_p9), [#allocation2]  }
  0x12   : > { %s2475_s27 = sshll.u32 (!%p178_p9), %s2534_s23, 4  ;;  %s2476_s27 = int_to_ptr.vmem [resolvable:$false] %s2475_s27 }
  0x13   : > { %v236_v0 = vld [vmem:[%s3203_s2 + $0x18] sm:$0xff]  ;;  %v235_v1 = vld [vmem:[%s3203_s2 + $0x10] sm:$0xff]  ;;  %v234_v2 = vld [vmem:[%s3203_s2 + $0x8] sm:$0xff]  ;;  %v2533_v7 = vmov 0   ;;  %s3213_s7 = smov (!%p209_p10, %s2033_s7), 15  ;;  %vm237_vm0 = vcmask 261120  }
  0x14   : > { %v2620_v3 = vand.u32 4294901760, %v236_v0  ;;  %v2622_v4 = vand.u32 4294901760, %v235_v1  ;;  %v2624_v5 = vand.u32 4294901760, %v234_v2  ;;  %v233_v6 = vld [vmem:[%s3203_s2] sm:$0xff]  ;;  %2469 = vset.pattern.permute.xlu0 %v2533_v7  ;;  %2470 = vset.pattern.permute.xlu1 %v2533_v7  ;;  %s2034_s10 = sshll.u32 %s3213_s7, 3  ;;  %vm1112_vm1 = vcmask 1040384  }
  0x15   : > { %v2629_v8 = vand.u32 4294901760, %v233_v6  ;;  %s212_s13 = scalar_lea.vmem %s3201_s0, %s2034_s10  ;;  %s2672_s22 = scalar_lea.vmem %s3204_s3, %s2034_s10  ;;  %vm1931_vm2 = vcmask 130048  }
  0x16   : > { %2187 = vmatprep.subr.mxu0 %v2620_v3  ;;  %v2633_v9 = vsub.f32 %v236_v0, %v2620_v3  ;;  %v2636_v10 = vsub.f32 %v235_v1, %v2622_v4  ;;  %v2639_v11 = vsub.f32 %v234_v2, %v2624_v5  ;;  %v221_v20 = vld [vmem:[%s212_s13] sm:$0xff]  ;;  %v222_v21 = vld [vmem:[%s212_s13 + $0x8] sm:$0xff]  ;;  %v223_v22 = vld [vmem:[%s212_s13 + $0x10] sm:$0xff]  ;;  %s3125_s10 = scalar_lea.vmem [#allocation2], %s2032_s9  ;;  %s2477_s28 = scalar_lea.vmem %s2476_s27, 2048 }
  0x17   : > { %2188 = vmatpush3.msra.mxu0 %v2620_v3  ;;  %v2643_v12 = vsub.f32 %v233_v6, %v2629_v8  ;;  %v239_v24 = vsel %vm237_vm0, %v221_v20, 0  ;;  %v242_v25 = vsel %vm237_vm0, %v222_v21, 0  ;;  %v245_v26 = vsel %vm237_vm0, %v223_v22, 0  ;;  %v224_v27 = vld [vmem:[%s212_s13 + $0x18] sm:$0xff]  ;;  %v225_v28 = vld [vmem:[%s212_s13 + $0x20] sm:$0xff]  ;;  %v226_v29 = vld [vmem:[%s212_s13 + $0x28] sm:$0xff] }
  0x18   : > { %v2646_v13 = vand.u32 4294901760, %v2633_v9  ;;  %2189 = vmatprep.subr.mxu0 %v2622_v4  ;;  %v2650_v14 = vand.u32 4294901760, %v2636_v10  ;;  %v2653_v15 = vand.u32 4294901760, %v2639_v11  ;;  %v2681_v33 = vand.u32 4294901760, %v239_v24  ;;  %v227_v34 = vld [vmem:[%s212_s13 + $0x30] sm:$0xff]  ;;  %v228_v39 = vld [vmem:[%s212_s13 + $0x38] sm:$0xff] }
  0x19   : > { %2190 = vmatpush3.msra.mxu0 %v2622_v4  ;;  %v2657_v16 = vand.u32 4294901760, %v2643_v12  ;;  %v2684_v36 = vand.u32 4294901760, %v242_v25  ;;  %v2686_v37 = vand.u32 4294901760, %v245_v26  ;;  %v248_v38 = vsel %vm237_vm0, %v224_v27, 0  ;;  %v1048_v40 = vld [vmem:[%s2672_s22] sm:$0xff]  ;;  %v1050_v45 = vld [vmem:[%s2672_s22 + $0x10] sm:$0xff] }
  0x1a   : > { %v439_v17 = vsub.f32 %v2633_v9, %v2646_v13  ;;  %v446_v18 = vsub.f32 %v2636_v10, %v2650_v14  ;;  %2191 = vmatprep.subr.mxu0 %v2624_v5  ;;  %v453_v19 = vsub.f32 %v2639_v11, %v2653_v15  ;;  %v2691_v41 = vsub.f32 %v239_v24, %v2681_v33  ;;  %v1049_v58 = vld [vmem:[%s2672_s22 + $0x8] sm:$0xff]  ;;  %v1051_v63 = vld [vmem:[%s2672_s22 + $0x18] sm:$0xff]  ;;  %s1954_s12 = sshll.u32 %s3125_s10, 4  ;;  %s3152_s12 = int_to_ptr.vmem [resolvable:$true] %s1954_s12 }
  0x1b   : > { %2192 = vmatpush3.msra.mxu0 %v2624_v5  ;;  %v460_v23 = vsub.f32 %v2643_v12, %v2657_v16  ;;  %2215 = vmatprep.mubr.f32.mxu1 %v2681_v33  ;;  %v2694_v42 = vand.u32 4294901760, %v248_v38  ;;  %v251_v43 = vsel %vm237_vm0, %v225_v28, 0  ;;  %v254_v44 = vsel %vm237_vm0, %v226_v29, 0  ;;  %p2478_p0 = scmp.lt.s32.totalorder %s3152_s12, %s2476_s27 }
  0x1c   : > { %v440_v30 = vand.u32 4294901760, %v439_v17  ;;  %v447_v31 = vand.u32 4294901760, %v446_v18  ;;  %v454_v32 = vand.u32 4294901760, %v453_v19  ;;  %2193 = vmatprep.subr.mxu0 %v2629_v8  ;;  %v2701_v46 = vsub.f32 %v242_v25, %v2684_v36  ;;  %1058 = vperm.xlu0 %2469, %v1048_v40  }
  0x1d   : > { %2194 = vmatpush3.msra.mxu0 %v2629_v8  ;;  %v461_v35 = vand.u32 4294901760, %v460_v23  ;;  %v2704_v47 = vsub.f32 %v245_v26, %v2686_v37  ;;  %v2706_v48 = vand.u32 4294901760, %v251_v43  ;;  %v2708_v49 = vand.u32 4294901760, %v254_v44  ;;  %1068 = vperm.xlu1 %2470, %v1050_v45  }
  0x1e   : > { %2207 = vmatprep.subr.mxu1 %v440_v30  ;;  %2227 = vmatprep.subr.mxu0 %v2633_v9  ;;  %v2711_v50 = vand.u32 4294901760, %v2691_v41  ;;  %v2714_v51 = vsub.f32 %v248_v38, %v2694_v42  ;;  %v257_v52 = vsel %vm237_vm0, %v227_v34, 0  ;;  %v260_v53 = vsel %vm237_vm0, %v228_v39, 0  ;;  %v229_v39 = vld [vmem:[%s3202_s1] sm:$0xff] }
  0x1f   : > { %2208 = vmatpush3.msra.mxu1 %v440_v30  ;;  %v2719_v54 = vand.u32 4294901760, %v2701_v46  ;;  %v2722_v55 = vand.u32 4294901760, %v2704_v47  ;;  %v2725_v56 = vsub.f32 %v251_v43, %v2706_v48  ;;  %v2728_v57 = vsub.f32 %v254_v44, %v2708_v49 }
  0x20   : > { %2209 = vmatprep.subr.mxu1 %v447_v31  ;;  %v334_v59 = vsub.f32 %v2691_v41, %v2711_v50  ;;  %v2734_v60 = vand.u32 4294901760, %v2714_v51  ;;  %v2736_v61 = vand.u32 4294901760, %v257_v52  ;;  %v2738_v62 = vand.u32 4294901760, %v260_v53  ;;  %1063 = vperm.xlu0 %2469, %v1049_v58  }
  0x21   : > { %2210 = vmatpush3.msra.mxu1 %v447_v31  ;;  %v344_v0 = vsub.f32 %v2701_v46, %v2719_v54  ;;  %v354_v1 = vsub.f32 %v2704_v47, %v2722_v55  ;;  %v2746_v2 = vand.u32 4294901760, %v2725_v56  ;;  %v2749_v6 = vand.u32 4294901760, %v2728_v57  ;;  %1073 = vperm.xlu1 %2470, %v1051_v63  }
  0x22   : > { %2211 = vmatprep.subr.mxu1 %v454_v32  ;;  %v2751_v7 = vand.u32 4294901760, %v334_v59  ;;  %v364_v17 = vsub.f32 %v2714_v51, %v2734_v60  ;;  %v2756_v18 = vsub.f32 %v257_v52, %v2736_v61  ;;  %v2759_v19 = vsub.f32 %v260_v53, %v2738_v62 }
  0x23   : > { %2212 = vmatpush3.msra.mxu1 %v454_v32  ;;  %v2761_v20 = vand.u32 4294901760, %v344_v0  ;;  %v2763_v21 = vand.u32 4294901760, %v354_v1  ;;  %v374_v22 = vsub.f32 %v2725_v56, %v2746_v2  ;;  %v384_v25 = vsub.f32 %v2728_v57, %v2749_v6 }
  0x24   : > { %2213 = vmatprep.subr.mxu1 %v461_v35  ;;  %2195 = vmatprep.mubr.f32.mxu0 %v2751_v7  ;;  %v2770_v23 = vand.u32 4294901760, %v2756_v18  ;;  %v2774_v24 = vand.u32 4294901760, %v364_v17  ;;  %v2779_v26 = vand.u32 4294901760, %v2759_v19  ;;  %v2876_v43 = vand.u32 4294901760, %v229_v39 }
  0x25   : > { %2214 = vmatpush3.msra.mxu1 %v461_v35  ;;  %2196 = vmatmul.mubr.f32.vlgmr.msra.gmra.mxu0 %v2761_v20  ;;  %v2785_v27 = vand.u32 4294901760, %v374_v22  ;;  %v230_v35 = vld [vmem:[%s3202_s1 + $0x8] sm:$0xff] }
  0x26   : > { %2216 = vmatmul.mubr.f32.vlgmr.msra.gmra.mxu1 %v2684_v36  ;;  %2247 = vmatprep.subr.mxu1 %v2620_v3  ;;  %v394_v28 = vsub.f32 %v2756_v18, %v2770_v23  ;;  %v404_v29 = vsub.f32 %v2759_v19, %v2779_v26  ;;  %v2855_v38 = vand.u32 4294901760, %v230_v35 }
  0x27   : > { %2228 = vmatpush3.msra.mxu0 %v2633_v9  ;;  %2248 = vmatpush3.msra.mxu1 %v2620_v3  ;;  %v2793_v9 = vand.u32 4294901760, %v384_v25 }
  0x28   : > { %2198 = vmatprep.mubr.f32.mxu0 %v2763_v21  ;;  %2218 = vmatprep.mubr.f32.mxu1 %v2686_v37  ;;  %v2801_v30 = vand.u32 4294901760, %v394_v28  ;;  %v2807_v31 = vand.u32 4294901760, %v404_v29  ;;  %v2874_v40 = vsub.f32 %v230_v35, %v2855_v38 }
  0x29   : > { %2229 = vmatprep.subr.mxu0 %v2636_v10  ;;  %2199 = vmatmul.mubr.f32.gmra.mxu0 %v2774_v24 }
  0x2a   : > { %2219 = vmatmul.mubr.f32.gmra.mxu1 %v2694_v42  ;;  %2249 = vmatprep.subr.mxu1 %v2622_v4 }
  0x2b   : > { %2230 = vmatpush3.msra.mxu0 %v2636_v10  ;;  %2250 = vmatpush3.msra.mxu1 %v2622_v4  ;;  %v232_v10 = vld [vmem:[%s3202_s1 + $0x18] sm:$0xff] }
  0x2c   : > { %2201 = vmatprep.mubr.f32.mxu0 %v2785_v27  ;;  %2221 = vmatprep.mubr.f32.mxu1 %v2706_v48  ;;  %v2820_v32 = vand.u32 4294901760, %v232_v10 }
  0x2d   : > { %2231 = vmatprep.subr.mxu0 %v2639_v11  ;;  %2202 = vmatmul.mubr.f32.gmra.mxu0 %v2793_v9 }
  0x2e   : > { %2222 = vmatmul.mubr.f32.gmra.mxu1 %v2708_v49  ;;  %2251 = vmatprep.subr.mxu1 %v2624_v5 }
  0x2f   : > { %2232 = vmatpush3.msra.mxu0 %v2639_v11  ;;  %2252 = vmatpush3.msra.mxu1 %v2624_v5  ;;  %v231_v11 = vld [vmem:[%s3202_s1 + $0x10] sm:$0xff] }
  0x30   : > { %2204 = vmatprep.mubr.f32.mxu0 %v2801_v30  ;;  %2224 = vmatprep.mubr.f32.mxu1 %v2736_v61  ;;  %v2836_v34 = vand.u32 4294901760, %v231_v11 }
  0x31   : > { %2233 = vmatprep.subr.mxu0 %v2643_v12  ;;  %2205 = vmatmul.mubr.f32.gmra.mxu0 %v2807_v31 }
  0x32   : > { %2225 = vmatmul.mubr.f32.gmra.mxu1 %v2738_v62  ;;  %2253 = vmatprep.subr.mxu1 %v2629_v8 }
  0x33   : > { %2234 = vmatpush3.msra.mxu0 %v2643_v12  ;;  %2254 = vmatpush3.msra.mxu1 %v2629_v8  ;;  %v2834_v12 = vsub.f32 %v232_v10, %v2820_v32 }
  0x34   : > { %2235 = vmatprep.mubr.f32.mxu0 %v2691_v41  ;;  %2255 = vmatprep.mubr.f32.mxu1 %v2711_v50 }
  0x35   : > { %2267 = vmatprep.subr.mxu0 %v2646_v13  ;;  %2236 = vmatmul.mubr.f32.vlgmr.msra.gmra.mxu0 %v2701_v46 }
  0x36   : > { %2256 = vmatmul.mubr.f32.vlgmr.msra.gmra.mxu1 %v2719_v54  ;;  %2287 = vmatprep.subr.mxu1 %v2620_v3 }
  0x37   : > { %2268 = vmatpush3.msra.mxu0 %v2646_v13  ;;  %2288 = vmatpush3.msra.mxu1 %v2620_v3  ;;  %v2850_v13 = vand.u32 4294901760, %v2834_v12  ;;  %v2853_v3 = vsub.f32 %v231_v11, %v2836_v34 }
  0x38   : > { %2238 = vmatprep.mubr.f32.mxu0 %v2704_v47  ;;  %2258 = vmatprep.mubr.f32.mxu1 %v2722_v55 }
  0x39   : > { %2269 = vmatprep.subr.mxu0 %v2650_v14  ;;  %2239 = vmatmul.mubr.f32.gmra.mxu0 %v2714_v51 }
  0x3a   : > { %2259 = vmatmul.mubr.f32.gmra.mxu1 %v2734_v60  ;;  %2289 = vmatprep.subr.mxu1 %v2622_v4 }
  0x3b   : > { %2270 = vmatpush3.msra.mxu0 %v2650_v14  ;;  %2290 = vmatpush3.msra.mxu1 %v2622_v4  ;;  %v1314_v14 = vsub.f32 %v2834_v12, %v2850_v13  ;;  %v2871_v4 = vand.u32 4294901760, %v2853_v3 }
  0x3c   : > { %2241 = vmatprep.mubr.f32.mxu0 %v2725_v56  ;;  %2261 = vmatprep.mubr.f32.mxu1 %v2746_v2 }
  0x3d   : > { %2271 = vmatprep.subr.mxu0 %v2653_v15  ;;  %2242 = vmatmul.mubr.f32.gmra.mxu0 %v2728_v57  ;;  %v1315_v44 = vand.u32 4294901760, %v1314_v14  ;;  %v1321_v45 = vsub.f32 %v2853_v3, %v2871_v4 }
  0x3e   : > { %2262 = vmatmul.mubr.f32.gmra.mxu1 %v2749_v6  ;;  %2291 = vmatprep.subr.mxu1 %v2624_v5 }
  0x3f   : > { %2272 = vmatpush3.msra.mxu0 %v2653_v15  ;;  %2292 = vmatpush3.msra.mxu1 %v2624_v5  ;;  %v2889_v15 = vand.u32 4294901760, %v2874_v40  ;;  %v2892_v5 = vsub.f32 %v229_v39, %v2876_v43  ;;  %v1322_v52 = vand.u32 4294901760, %v1321_v45 }
  0x40   : > { %2244 = vmatprep.mubr.f32.mxu0 %v2756_v18  ;;  %2264 = vmatprep.mubr.f32.mxu1 %v2770_v23 }
  0x41   : > { %2273 = vmatprep.subr.mxu0 %v2657_v16  ;;  %2245 = vmatmul.mubr.f32.gmra.mxu0 %v2759_v19  ;;  %v1328_v53 = vsub.f32 %v2874_v40, %v2889_v15  ;;  %v2904_v58 = vand.u32 4294901760, %v2892_v5 }
  0x42   : > { %2265 = vmatmul.mubr.f32.gmra.mxu1 %v2779_v26  ;;  %2293 = vmatprep.subr.mxu1 %v2629_v8 }
  0x43   : > { %2274 = vmatpush3.msra.mxu0 %v2657_v16  ;;  %2294 = vmatpush3.msra.mxu1 %v2629_v8  ;;  %v1329_v8 = vand.u32 4294901760, %v1328_v53  ;;  %v1335_v16 = vsub.f32 %v2892_v5, %v2904_v58 }
  0x44   : > { %2275 = vmatprep.mubr.f32.mxu0 %v2681_v33  ;;  %2295 = vmatprep.mubr.f32.mxu1 %v2681_v33 }
  0x45   : > { %2307 = vmatprep.subr.mxu0 %v2820_v32  ;;  %2276 = vmatmul.mubr.f32.vlgmr.msra.gmra.mxu0 %v2684_v36  ;;  %v1336_v59 = vand.u32 4294901760, %v1335_v16 }
  0x46   : > { %2296 = vmatmul.mubr.f32.vlgmr.msra.gmra.mxu1 %v2684_v36  ;;  %2327 = vmatprep.subr.mxu1 %v1315_v44 }
  0x47   : > { %2308 = vmatpush3.msra.mxu0 %v2820_v32  ;;  %2328 = vmatpush3.msra.mxu1 %v1315_v44 }
  0x48   : > { %2278 = vmatprep.mubr.f32.mxu0 %v2686_v37  ;;  %2298 = vmatprep.mubr.f32.mxu1 %v2686_v37 }
  0x49   : > { %2309 = vmatprep.subr.mxu0 %v2836_v34  ;;  %2279 = vmatmul.mubr.f32.gmra.mxu0 %v2694_v42 }
  0x4a   : > { %2299 = vmatmul.mubr.f32.gmra.mxu1 %v2694_v42  ;;  %2329 = vmatprep.subr.mxu1 %v1322_v52 }
  0x4b   : > { %2310 = vmatpush3.msra.mxu0 %v2836_v34  ;;  %2330 = vmatpush3.msra.mxu1 %v1322_v52 }
  0x4c   : > { %2281 = vmatprep.mubr.f32.mxu0 %v2706_v48  ;;  %2301 = vmatprep.mubr.f32.mxu1 %v2706_v48 }
  0x4d   : > { %2311 = vmatprep.subr.mxu0 %v2855_v38  ;;  %2282 = vmatmul.mubr.f32.gmra.mxu0 %v2708_v49 }
  0x4e   : > { %2302 = vmatmul.mubr.f32.gmra.mxu1 %v2708_v49  ;;  %2331 = vmatprep.subr.mxu1 %v1329_v8 }
  0x4f   : > { %2312 = vmatpush3.msra.mxu0 %v2855_v38  ;;  %2332 = vmatpush3.msra.mxu1 %v1329_v8 }
  0x50   : > { %2284 = vmatprep.mubr.f32.mxu0 %v2736_v61  ;;  %2304 = vmatprep.mubr.f32.mxu1 %v2736_v61 }
  0x51   : > { %2313 = vmatprep.subr.mxu0 %v2876_v43  ;;  %2285 = vmatmul.mubr.f32.gmra.mxu0 %v2738_v62 }
  0x52   : > { %2305 = vmatmul.mubr.f32.gmra.mxu1 %v2738_v62  ;;  %2333 = vmatprep.subr.mxu1 %v1336_v59 }
  0x53   : > { %2314 = vmatpush3.msra.mxu0 %v2876_v43  ;;  %2334 = vmatpush3.msra.mxu1 %v1336_v59 }
  0x54   : > { %2315 = vmatprep.mubr.f32.mxu0 %v2751_v7  ;;  %2335 = vmatprep.mubr.f32.mxu1 %v2681_v33 }
  0x55   : > { %2347 = vmatprep.subr.mxu0 %v2834_v12  ;;  %2316 = vmatmul.mubr.f32.vlgmr.msra.gmra.mxu0 %v2761_v20 }
  0x56   : > { %2336 = vmatmul.mubr.f32.vlgmr.msra.gmra.mxu1 %v2684_v36  ;;  %2367 = vmatprep.subr.mxu1 %v2820_v32 }
  0x57   : > { %2348 = vmatpush3.msra.mxu0 %v2834_v12  ;;  %2368 = vmatpush3.msra.mxu1 %v2820_v32 }
  0x58   : > { %2318 = vmatprep.mubr.f32.mxu0 %v2763_v21  ;;  %2338 = vmatprep.mubr.f32.mxu1 %v2686_v37 }
  0x59   : > { %2349 = vmatprep.subr.mxu0 %v2853_v3  ;;  %2319 = vmatmul.mubr.f32.gmra.mxu0 %v2774_v24 }
  0x5a   : > { %2339 = vmatmul.mubr.f32.gmra.mxu1 %v2694_v42  ;;  %2369 = vmatprep.subr.mxu1 %v2836_v34 }
  0x5b   : > { %2350 = vmatpush3.msra.mxu0 %v2853_v3  ;;  %2370 = vmatpush3.msra.mxu1 %v2836_v34 }
  0x5c   : > { %2321 = vmatprep.mubr.f32.mxu0 %v2785_v27  ;;  %2341 = vmatprep.mubr.f32.mxu1 %v2706_v48 }
  0x5d   : > { %2351 = vmatprep.subr.mxu0 %v2874_v40  ;;  %2322 = vmatmul.mubr.f32.gmra.mxu0 %v2793_v9 }
  0x5e   : > { %2342 = vmatmul.mubr.f32.gmra.mxu1 %v2708_v49  ;;  %2371 = vmatprep.subr.mxu1 %v2855_v38 }
  0x5f   : > { %2352 = vmatpush3.msra.mxu0 %v2874_v40  ;;  %2372 = vmatpush3.msra.mxu1 %v2855_v38 }
  0x60   : > { %2324 = vmatprep.mubr.f32.mxu0 %v2801_v30  ;;  %2344 = vmatprep.mubr.f32.mxu1 %v2736_v61 }
  0x61   : > { %2353 = vmatprep.subr.mxu0 %v2892_v5  ;;  %2325 = vmatmul.mubr.f32.gmra.mxu0 %v2807_v31 }
  0x62   : > { %2345 = vmatmul.mubr.f32.gmra.mxu1 %v2738_v62  ;;  %2373 = vmatprep.subr.mxu1 %v2876_v43 }
  0x63   : > { %2354 = vmatpush3.msra.mxu0 %v2892_v5  ;;  %2374 = vmatpush3.msra.mxu1 %v2876_v43 }
  0x64   : > { %2355 = vmatprep.mubr.f32.mxu0 %v2691_v41  ;;  %2375 = vmatprep.mubr.f32.mxu1 %v2711_v50  ;;  %v1053_v41 = vld [vmem:[%s2672_s22 + $0x28] sm:$0xff]  ;;  %v1054_v50 = vld [vmem:[%s2672_s22 + $0x30] sm:$0xff] }
  0x65   : > { %2387 = vmatprep.subr.mxu0 %v2850_v13  ;;  %2356 = vmatmul.mubr.f32.vlgmr.msra.gmra.mxu0 %v2701_v46  ;;  %v1052_v46 = vld [vmem:[%s2672_s22 + $0x20] sm:$0xff] }
  0x66   : > { %2376 = vmatmul.mubr.f32.vlgmr.msra.gmra.mxu1 %v2719_v54  ;;  %2407 = vmatprep.subr.mxu1 %v2820_v32 }
  0x67   : > { %2388 = vmatpush3.msra.mxu0 %v2850_v13  ;;  %2408 = vmatpush3.msra.mxu1 %v2820_v32 }
  0x68   : > { %2358 = vmatprep.mubr.f32.mxu0 %v2704_v47  ;;  %2378 = vmatprep.mubr.f32.mxu1 %v2722_v55  ;;  %v1055_v47 = vld [vmem:[%s2672_s22 + $0x38] sm:$0xff]  ;;  %s2471_s22 = scalar_lea.vmem %s3152_s12, 1024 }
  0x69   : > { %2389 = vmatprep.subr.mxu0 %v2871_v4  ;;  %2359 = vmatmul.mubr.f32.gmra.mxu0 %v2714_v51  ;;  %p2472_p11 = scmp.ne.s32.totalorder %s3152_s12, %s2471_s22  ;;  %p2479_p1 = scmp.lt.s32.totalorder %s2477_s28, %s2471_s22 }
  0x6a   : > { %2379 = vmatmul.mubr.f32.gmra.mxu1 %v2734_v60  ;;  %2409 = vmatprep.subr.mxu1 %v2836_v34 }
  0x6b   : > { %2390 = vmatpush3.msra.mxu0 %v2871_v4  ;;  %2410 = vmatpush3.msra.mxu1 %v2836_v34  ;;  %p2473_p12 = pnand %p2472_p11, %p2600_p5  ;;  %p2480_p2 = por %p2479_p1, %p2478_p0 }
  0x6c   : > { %2361 = vmatprep.mubr.f32.mxu0 %v2725_v56  ;;  %2381 = vmatprep.mubr.f32.mxu1 %v2746_v2 }
  0x6d   : > { %2391 = vmatprep.subr.mxu0 %v2889_v15  ;;  %2362 = vmatmul.mubr.f32.gmra.mxu0 %v2728_v57  ;;  %p2474_p13 = pneg %p2473_p12 }
  0x6e   : > { %2382 = vmatmul.mubr.f32.gmra.mxu1 %v2749_v6  ;;  %2411 = vmatprep.subr.mxu1 %v2855_v38 }
  0x6f   : > { %2392 = vmatpush3.msra.mxu0 %v2889_v15  ;;  %2412 = vmatpush3.msra.mxu1 %v2855_v38  ;;  %p2481_p3 = pnand %p2480_p2, %p2474_p13 }
  0x70   : > { %2364 = vmatprep.mubr.f32.mxu0 %v2756_v18  ;;  %2384 = vmatprep.mubr.f32.mxu1 %v2770_v23 }
  0x71   : > { %2393 = vmatprep.subr.mxu0 %v2904_v58  ;;  %2365 = vmatmul.mubr.f32.gmra.mxu0 %v2759_v19 }
  0x72   : > { %2385 = vmatmul.mubr.f32.gmra.mxu1 %v2779_v26  ;;  %2413 = vmatprep.subr.mxu1 %v2876_v43 }
  0x73   : > { %2394 = vmatpush3.msra.mxu0 %v2904_v58  ;;  %2414 = vmatpush3.msra.mxu1 %v2876_v43 }
  0x74   : > { %2395 = vmatprep.mubr.f32.mxu0 %v2681_v33  ;;  %2415 = vmatprep.mubr.f32.mxu1 %v2681_v33 }
  0x75   : > { %1083 = vperm.xlu1 %2470, %v1053_v41   ;;  %2396 = vmatmul.mubr.f32.vlgmr.msra.gmra.mxu0 %v2684_v36 }
  0x76   : > { %2416 = vmatmul.mubr.f32.vlgmr.msra.gmra.mxu1 %v2684_v36  ;;  %2398 = vmatprep.mubr.f32.mxu0 %v2686_v37 }
  0x77   : > { %2418 = vmatprep.mubr.f32.mxu1 %v2686_v37  ;;  %1078 = vperm.xlu0 %2469, %v1052_v46  }
  0x79   : > { %1093 = vperm.xlu1 %2470, %v1055_v47   ;;  %2399 = vmatmul.mubr.f32.gmra.mxu0 %v2694_v42 }
  0x7a   : > { %2419 = vmatmul.mubr.f32.gmra.mxu1 %v2694_v42  ;;  %2401 = vmatprep.mubr.f32.mxu0 %v2706_v48 }
  0x7b   : > { %2421 = vmatprep.mubr.f32.mxu1 %v2706_v48  ;;  %1088 = vperm.xlu0 %2469, %v1054_v50  }
  0x7d   : > { %2402 = vmatmul.mubr.f32.gmra.mxu0 %v2708_v49 }
  0x7e   : > { %2422 = vmatmul.mubr.f32.gmra.mxu1 %v2708_v49  ;;  %2404 = vmatprep.mubr.f32.mxu0 %v2736_v61 }
  0x7f   : > { %2424 = vmatprep.mubr.f32.mxu1 %v2736_v61 }
  0x81   : > { %2405 = vmatmul.mubr.f32.gmra.mxu0 %v2738_v62 }
  0x82   : > { %2425 = vmatmul.mubr.f32.gmra.mxu1 %v2738_v62 }
  0x97   : > { %v1059_v47 = vpop.permute.xlu0 %1058 }
  0xe5   : > { %v2197_v36 = vpop.f32.mrf.mxu0 }
  0xe6   : > { %v2217_v33 = vpop.f32.mrf.mxu1 }
  0xe7   : > { %v337_v42 = vpop.f32.mrf.mxu0  ;;  %v505_v40 = vadd.f32 %v2217_v33, %v2197_v36 }
  0xe8   : > { %v498_v37 = vpop.f32.mrf.mxu1 }
  0xe9   : > { %v2200_v54 = vpop.f32.mrf.mxu0  ;;  %v499_v39 = vadd.f32 %v498_v37, %v337_v42 }
  0xea   : > { %v2220_v51 = vpop.f32.mrf.mxu1 }
  0xeb   : > { %v357_v55 = vpop.f32.mrf.mxu0  ;;  %v517_v58 = vadd.f32 %v2220_v51, %v2200_v54 }
  0xec   : > { %v510_v48 = vpop.f32.mrf.mxu1 }
  0xed   : > { %v2203_v57 = vpop.f32.mrf.mxu0  ;;  %v511_v15 = vadd.f32 %v510_v48, %v357_v55  ;;  %v1069_v48 = vpop.permute.xlu1 %1068 }
  0xee   : > { %v2223_v56 = vpop.f32.mrf.mxu1 }
  0xef   : > { %v377_v49 = vpop.f32.mrf.mxu0  ;;  %v529_v46 = vadd.f32 %v2223_v56, %v2203_v57 }
  0xf0   : > { %v522_v60 = vpop.f32.mrf.mxu1 }
  0xf1   : > { %v3013_v0 = vpop.f32.mrf.mxu0  ;;  %v523_v8 = vadd.f32 %v522_v60, %v377_v49 }
  0xf2   : > { %v3011_v63 = vpop.f32.mrf.mxu1 }
  0xf3   : > { %v397_v1 = vpop.f32.mrf.mxu0 }
  0xf4   : > { %v534_v61 = vpop.f32.mrf.mxu1 }
  0xf5   : > { %v2237_v62 = vpop.f32.mrf.mxu0  ;;  %v535_v49 = vadd.f32 %v534_v61, %v397_v1 }
  0xf6   : > { %v2257_v2 = vpop.f32.mrf.mxu1  ;;  %v628_v5 = vadd.f32 %v2237_v62, %v505_v40 }
  0xf7   : > { %v620_v7 = vpop.f32.mrf.mxu0 }
  0xf8   : > { %v746_v6 = vpop.f32.mrf.mxu1  ;;  %v621_v43 = vadd.f32 %v620_v7, %v499_v39  ;;  %v755_v33 = vadd.f32 %v2257_v2, %v628_v5  ;;  %v1064_v39 = vpop.permute.xlu0 %1063 }
  0xf9   : > { %v2240_v18 = vpop.f32.mrf.mxu0 }
  0xfa   : > { %v2260_v17 = vpop.f32.mrf.mxu1  ;;  %v747_v16 = vadd.f32 %v746_v6, %v621_v43  ;;  %v642_v36 = vadd.f32 %v2240_v18, %v517_v58  ;;  %v1074_v43 = vpop.permute.xlu1 %1073 }
  0xfb   : > { %v634_v20 = vpop.f32.mrf.mxu0 }
  0xfc   : > { %v762_v19 = vpop.f32.mrf.mxu1  ;;  %v635_v59 = vadd.f32 %v634_v20, %v511_v15  ;;  %v771_v56 = vadd.f32 %v2260_v17, %v642_v36 }
  0xfd   : > { %v2243_v22 = vpop.f32.mrf.mxu0 }
  0xfe   : > { %v2263_v21 = vpop.f32.mrf.mxu1  ;;  %v763_v7 = vadd.f32 %v762_v19, %v635_v59  ;;  %v656_v51 = vadd.f32 %v2243_v22, %v529_v46 }
  0xff   : > { %v648_v24 = vpop.f32.mrf.mxu0 }
 0x100   : > { %v778_v23 = vpop.f32.mrf.mxu1  ;;  %v649_v37 = vadd.f32 %v648_v24, %v523_v8  ;;  %v541_v24 = vadd.f32 %v3011_v63, %v3013_v0  ;;  %v787_v19 = vadd.f32 %v2263_v21, %v656_v51 }
 0x101   : > { %v3017_v26 = vpop.f32.mrf.mxu0 }
 0x102   : > { %v3015_v25 = vpop.f32.mrf.mxu1  ;;  %v779_v57 = vadd.f32 %v778_v23, %v649_v37  ;;  %v670_v17 = vadd.f32 %v3017_v26, %v541_v24 }
 0x103   : > { %v662_v28 = vpop.f32.mrf.mxu0 }
 0x104   : > { %v3019_v27 = vpop.f32.mrf.mxu1  ;;  %v803_v26 = vadd.f32 %v3015_v25, %v670_v17 }
 0x105   : > { %v2277_v29 = vpop.f32.mrf.mxu0 }
 0x106   : > { %v2297_v9 = vpop.f32.mrf.mxu1  ;;  %v892_v54 = vadd.f32 %v2277_v29, %v755_v33 }
 0x107   : > { %v885_v31 = vpop.f32.mrf.mxu0 }
 0x108   : > { %v1002_v30 = vpop.f32.mrf.mxu1  ;;  %v886_v42 = vadd.f32 %v885_v31, %v747_v16  ;;  %v663_v31 = vadd.f32 %v662_v28, %v535_v49  ;;  %v1009_v22 = vadd.f32 %v2297_v9, %v892_v54  ;;  %v1084_v16 = vpop.permute.xlu1 %1083 }
 0x109   : > { %v2280_v32 = vpop.f32.mrf.mxu0 }
 0x10a   : > { %v3021_v10 = vpop.f32.mrf.mxu1  ;;  %v1003_v20 = vadd.f32 %v1002_v30, %v886_v42  ;;  %v904_v29 = vadd.f32 %v2280_v32, %v771_v56  ;;  %v795_v0 = vadd.f32 %v3019_v27, %v663_v31  ;;  %v3067_v21 = vmul.f32 %v1064_v39, %v1009_v22 }
 0x10b   : > { %v897_v12 = vpop.f32.mrf.mxu0 }
 0x10c   : > { %v1014_v11 = vpop.f32.mrf.mxu1  ;;  %v898_v2 = vadd.f32 %v897_v12, %v763_v7  ;;  %v3060_v30 = vmul.f32 %v1059_v47, %v1003_v20  ;;  %v1021_v9 = vadd.f32 %v3021_v10, %v904_v29 }
 0x10d   : > { %v2283_v35 = vpop.f32.mrf.mxu0 }
 0x10e   : > { %v3023_v34 = vpop.f32.mrf.mxu1  ;;  %v1015_v12 = vadd.f32 %v1014_v11, %v898_v2  ;;  %v916_v15 = vadd.f32 %v2283_v35, %v787_v19  ;;  %v1113_v11 = vrot.slane %v3060_v30, 7  ;;  %v3079_v47 = vmul.f32 %v1074_v43, %v1021_v9 }
 0x10f   : > { %v909_v3 = vpop.f32.mrf.mxu0 }
 0x110   : > { %v1026_v13 = vpop.f32.mrf.mxu1  ;;  %v910_v61 = vadd.f32 %v909_v3, %v779_v57  ;;  %v1079_v3 = vpop.permute.xlu0 %1078  ;;  %v3074_v35 = vmul.f32 %v1069_v48, %v1015_v12  ;;  %v1033_v27 = vadd.f32 %v3023_v34, %v916_v15  ;;  %v1118_v49 = vrot.slane %v3079_v47, 7 }
 0x111   : > { %v3027_v14 = vpop.f32.mrf.mxu0  ;;  %v1094_v57 = vpop.permute.xlu1 %1093 }
 0x112   : > { %v3025_v38 = vpop.f32.mrf.mxu1  ;;  %v1027_v32 = vadd.f32 %v1026_v13, %v910_v61  ;;  %v928_v46 = vadd.f32 %v3027_v14, %v803_v26  ;;  %v1114_v13 = vrot.slane %v3067_v21, 7  ;;  %v1116_v37 = vrot.slane %v3074_v35, 7 }
 0x113   : > { %v921_v44 = vpop.f32.mrf.mxu0  ;;  %v3085_v42 = vmul.f32 %v1084_v16, %v1033_v27 }
 0x114   : > { %v3029_v4 = vpop.f32.mrf.mxu1  ;;  %v922_v58 = vadd.f32 %v921_v44, %v795_v0  ;;  %v3081_v33 = vmul.f32 %v1079_v3, %v1027_v32  ;;  %v1115_v34 = vsel %vm1112_vm1, %v1113_v11, %v1114_v13  ;;  %v1089_v48 = vpop.permute.xlu0 %1088  ;;  %v1045_v7 = vadd.f32 %v3025_v38, %v928_v46 }
 0x115   : > { %v3033_v52 = vpop.f32.mrf.mxu0  ;;  %v1122_v39 = vrot.slane %v3085_v42, 7  ;;  %v1119_v38 = vsel %vm1112_vm1, %v1116_v37, %v1118_v49  ;;  %v1117_v61 = vsel %vm1112_vm1, %v1114_v13, %v1116_v37 }
 0x116   : > { %v3031_v45 = vpop.f32.mrf.mxu1  ;;  %v1039_v44 = vadd.f32 %v3029_v4, %v922_v58  ;;  %v1223_v51 = vadd.f32 %v3033_v52, %v1115_v34  ;;  %v1120_v56 = vrot.slane %v3081_v33, 7  ;;  %v1136_v4 = vsel %vm1112_vm1, 0.0, %v1113_v11 }
 0x117   : > { %v3037_v41 = vpop.f32.mrf.mxu0  ;;  %v3098_v52 = vmul.f32 %v1094_v57, %v1045_v7 }
 0x118   : > { %v3035_v53 = vpop.f32.mrf.mxu1  ;;  %v3093_v2 = vmul.f32 %v1089_v48, %v1039_v44  ;;  %v1213_v24 = vadd.f32 %v3037_v41, %v1136_v4  ;;  %v1380_v22 = vadd.f32 %v3031_v45, %v1223_v51  ;;  %v1123_v17 = vsel %vm1112_vm1, %v1120_v56, %v1122_v39 }
 0x119   : > { %v3041_v55 = vpop.f32.mrf.mxu0  ;;  %v1121_v58 = vsel %vm1112_vm1, %v1118_v49, %v1120_v56 }
 0x11a   : > { %v3039_v50 = vpop.f32.mrf.mxu1  ;;  %v1243_v29 = vadd.f32 %v3041_v55, %v1119_v38  ;;  %v1124_v41 = vrot.slane %v3093_v2, 7  ;;  %v1374_v15 = vadd.f32 %v3035_v53, %v1213_v24  ;;  %v1126_v55 = vrot.slane %v3098_v52, 7 }
 0x11b   : > { %v3045_v60 = vpop.f32.mrf.mxu0 }
 0x11c   : > { %v3043_v62 = vpop.f32.mrf.mxu1  ;;  %v1233_v0 = vadd.f32 %v3045_v60, %v1117_v61  ;;  %v1392_v26 = vadd.f32 %v3039_v50, %v1243_v29  ;;  %v1127_v60 = vsel %vm1112_vm1, %v1124_v41, %v1126_v55 }
 0x11d   : > { %v3049_v18 = vpop.f32.mrf.mxu0 }
 0x11e   : > { %v3047_v6 = vpop.f32.mrf.mxu1  ;;  %v1263_v3 = vadd.f32 %v3049_v18, %v1123_v17  ;;  %v1386_v53 = vadd.f32 %v3043_v62, %v1233_v0 }
 0x11f   : > { %v3055_v1 = vpop.f32.mrf.mxu0 }
 0x120   : > { %v3053_v40 = vpop.f32.mrf.mxu1  ;;  %v1253_v16 = vadd.f32 %v3055_v1, %v1121_v58  ;;  %v1404_v44 = vadd.f32 %v3047_v6, %v1263_v3 }
 0x121   : > { %v3062_v63 = vpop.f32.mrf.mxu0 }
 0x122   : > { %v3058_v23 = vpop.f32.mrf.mxu1  ;;  %v1283_v50 = vadd.f32 %v3062_v63, %v1127_v60  ;;  %v1398_v62 = vadd.f32 %v3053_v40, %v1253_v16 }
 0x123   : > { %v3070_v5 = vpop.f32.mrf.mxu0 }
 0x124   : > { %v3065_v28 = vpop.f32.mrf.mxu1  ;;  %v1416_v63 = vadd.f32 %v3058_v23, %v1283_v50 }
 0x125   : > { %v2357_v59 = vpop.f32.mrf.mxu0 }
 0x126   : > { %v2377_v8 = vpop.f32.mrf.mxu1  ;;  %v1503_v9 = vadd.f32 %v2357_v59, %v1380_v22 }
 0x127   : > { %v1495_v25 = vpop.f32.mrf.mxu0 }
 0x128   : > { %v1621_v10 = vpop.f32.mrf.mxu1  ;;  %v1496_v11 = vadd.f32 %v1495_v25, %v1374_v15  ;;  %v1630_v59 = vadd.f32 %v2377_v8, %v1503_v9  ;;  %v1125_v25 = vsel %vm1112_vm1, %v1122_v39, %v1124_v41 }
 0x129   : > { %v2360_v14 = vpop.f32.mrf.mxu0  ;;  %v1273_v51 = vadd.f32 %v3070_v5, %v1125_v25 }
 0x12a   : > { %v2380_v36 = vpop.f32.mrf.mxu1  ;;  %v1517_v18 = vadd.f32 %v2360_v14, %v1392_v26  ;;  %v1622_v34 = vadd.f32 %v1621_v10, %v1496_v11 }
 0x12b   : > { %v1509_v20 = vpop.f32.mrf.mxu0  ;;  %v1410_v40 = vadd.f32 %v3065_v28, %v1273_v51 }
 0x12c   : > { %v1637_v54 = vpop.f32.mrf.mxu1  ;;  %v1510_v48 = vadd.f32 %v1509_v20, %v1386_v53  ;;  %v1646_v49 = vadd.f32 %v2380_v36, %v1517_v18 }
 0x12d   : > { %v2363_v19 = vpop.f32.mrf.mxu0 }
 0x12e   : > { %v2383_v31 = vpop.f32.mrf.mxu1  ;;  %v1531_v8 = vadd.f32 %v2363_v19, %v1404_v44  ;;  %v1638_v20 = vadd.f32 %v1637_v54, %v1510_v48 }
 0x12f   : > { %v1523_v12 = vpop.f32.mrf.mxu0 }
 0x130   : > { %v1653_v43 = vpop.f32.mrf.mxu1  ;;  %v1524_v4 = vadd.f32 %v1523_v12, %v1398_v62  ;;  %v1662_v5 = vadd.f32 %v2383_v31, %v1531_v8 }
 0x131   : > { %v2366_v45 = vpop.f32.mrf.mxu0 }
 0x132   : > { %v2386_v32 = vpop.f32.mrf.mxu1  ;;  %v1545_v29 = vadd.f32 %v2366_v45, %v1416_v63  ;;  %v1654_v61 = vadd.f32 %v1653_v43, %v1524_v4 }
 0x133   : > { %v1537_v46 = vpop.f32.mrf.mxu0 }
 0x134   : > { %v1669_v27 = vpop.f32.mrf.mxu1  ;;  %v1538_v12 = vadd.f32 %v1537_v46, %v1410_v40  ;;  %v1678_v9 = vadd.f32 %v2386_v32, %v1545_v29 }
 0x135   : > { %v2397_v37 = vpop.f32.mrf.mxu0 }
 0x136   : > { %v2417_v13 = vpop.f32.mrf.mxu1  ;;  %v1767_v7 = vadd.f32 %v2397_v37, %v1630_v59  ;;  %v1670_v26 = vadd.f32 %v1669_v27, %v1538_v12 }
 0x137   : > { %v1760_v14 = vpop.f32.mrf.mxu0 }
 0x138   : > { %v1877_v1 = vpop.f32.mrf.mxu1  ;;  %v1884_v56 = vadd.f32 %v2417_v13, %v1767_v7  ;;  %v1761_v6 = vadd.f32 %v1760_v14, %v1622_v34 }
 0x139   : > { %v2400_v10 = vpop.f32.mrf.mxu0 }
 0x13a   : > { %v2420_v57 = vpop.f32.mrf.mxu1  ;;  %v1924_v24 = vsub.f32 %v1884_v56, %v3067_v21  ;;  %v1878_v39 = vadd.f32 %v1877_v1, %v1761_v6  ;;  %v1779_v38 = vadd.f32 %v2400_v10, %v1646_v49 }
 0x13b   : > { %v1772_v19 = vpop.f32.mrf.mxu0 }
 0x13c   : > { %v1889_v22 = vpop.f32.mrf.mxu1  ;;  %1933 = vst.msk [vmem:[%s3125_s10 + $0x8] sm:$0xff] %vm1931_vm2, %v1924_v24  ;;  %v1923_v23 = vsub.f32 %v1878_v39, %v3060_v30  ;;  %v1896_v36 = vadd.f32 %v2420_v57, %v1779_v38  ;;  %v1773_v54 = vadd.f32 %v1772_v19, %v1638_v20 }
 0x13d   : > { %v2403_v17 = vpop.f32.mrf.mxu0 }
 0x13e   : > { %v2423_v21 = vpop.f32.mrf.mxu1  ;;  %1932 = vst.msk [vmem:[%s3125_s10] sm:$0xff] %vm1931_vm2, %v1923_v23  ;;  %v1926_v28 = vsub.f32 %v1896_v36, %v3079_v47  ;;  %v1890_v31 = vadd.f32 %v1889_v22, %v1773_v54  ;;  %v1791_v41 = vadd.f32 %v2403_v17, %v1662_v5 }
 0x13f   : > { %v1784_v0 = vpop.f32.mrf.mxu0 }
 0x140   : > { %v1901_v15 = vpop.f32.mrf.mxu1  ;;  %1935 = vst.msk [vmem:[%s3125_s10 + $0x18] sm:$0xff] %vm1931_vm2, %v1926_v28  ;;  %v1925_v30 = vsub.f32 %v1890_v31, %v3074_v35  ;;  %v1908_v43 = vadd.f32 %v2423_v21, %v1791_v41  ;;  %v1785_v3 = vadd.f32 %v1784_v0, %v1654_v61 }
 0x141   : > { %v2406_v45 = vpop.f32.mrf.mxu0 }
 0x142   : > { %v2426_v55 = vpop.f32.mrf.mxu1  ;;  %1934 = vst.msk [vmem:[%s3125_s10 + $0x10] sm:$0xff] %vm1931_vm2, %v1925_v30  ;;  %v1928_v47 = vsub.f32 %v1908_v43, %v3085_v42  ;;  %v1902_v58 = vadd.f32 %v1901_v15, %v1785_v3  ;;  %v1803_v11 = vadd.f32 %v2406_v45, %v1678_v9 }
 0x143   : > { %v1796_v32 = vpop.f32.mrf.mxu0 }
 0x144   : > { %1937 = vst.msk [vmem:[%s3125_s10 + $0x28] sm:$0xff] %vm1931_vm2, %v1928_v47  ;;  %v1927_v35 = vsub.f32 %v1902_v58, %v3081_v33  ;;  %v1920_v16 = vadd.f32 %v2426_v55, %v1803_v11  ;;  %v1797_v46 = vadd.f32 %v1796_v32, %v1670_v26  ;;  %v1913_v27 = vpop.f32.mrf.mxu1 }
 0x146   : > { %1936 = vst.msk [vmem:[%s3125_s10 + $0x20] sm:$0xff] %vm1931_vm2, %v1927_v35  ;;  %v1930_v42 = vsub.f32 %v1920_v16, %v3098_v52  ;;  %v1914_v53 = vadd.f32 %v1913_v27, %v1797_v46 }
 0x148   : > { %1939 = vst.msk [vmem:[%s3125_s10 + $0x38] sm:$0xff] %vm1931_vm2, %v1930_v42  ;;  %v1929_v33 = vsub.f32 %v1914_v53, %v3093_v2 }
 0x14a   : > { %1938 = vst.msk [vmem:[%s3125_s10 + $0x30] sm:$0xff] %vm1931_vm2, %v1929_v33 }
 0x14b   : > { %2484 = shalt.err (!%p2481_p3)
}
 0x14c   : > { %s2485_s29 = scalar_lea.hbm %s3150_s20, 1024  ;;  %s2489_s6 = scalar_lea.hbm %s3205_s4, 2048 }
 0x14d   : > { %p2486_p4 = scmp.ne.s32.totalorder %s3150_s20, %s2485_s29  ;;  %p2490_p9 = scmp.lt.s32.totalorder %s3150_s20, %s3205_s4 }
 0x14e   : > { %p2491_p10 = scmp.lt.s32.totalorder %s2489_s6, %s2485_s29 }
 0x14f   : > { %p2487_p7 = pnand %p2486_p4, %p2600_p5 }
 0x150   : > { %p2492_p11 = por %p2491_p10, %p2490_p9 }
 0x151   : > { %p2488_p8 = pneg %p2487_p7 }
 0x153   : > { %p2493_p12 = pnand %p2492_p11, %p2488_p8 }
 0x155   : > { %2496 = shalt.err (!%p2493_p12)
}
 0x156   : > { %s2535_s9 = smov 128   ;;  %s2536_s10 = smov 8  }
 0x157   : > { %2427 = dma.vmem_to_hbm [thread:$0]  (%p2600_p5), %s3152_s12, 1024, %s3150_s20, %s3161_s19, %s2535_s9, %s2535_s9, %s2536_s10  }
 0x158 PF: > { %p2433_p13 = scmp.ge.s32.totalorder %s2531_s18, 2  ;;  %s1969_s11 = sand.u32 1, %s2519_s15  }
 0x159   : > { %s1970_s13 = scalar_lea.sflag [#allocation3], %s1969_s11 }
 0x15a   : > { %p2430_p0 = pnand %p2433_p13, %p2604_p6 }
 0x15c   : > { %p2431_p1 = pneg %p2430_p0 }
 0x15e   : > { %2514 = dma.done.wait (%p2431_p1), %s1970_s13, 1024  }
 0x15f   : > { %2516 = vsyncadd (%p2431_p1), %s1970_s13, 4294966272  ;;  %p14_p2 = scmp.ge.s32.totalorder %s2587_s21, 4   ;;  %s3208_s15 = smov %s2523_s16 }
 0x160   : > { %s3209_s16 = smov %s2527_s17  ;;  %s3210_s17 = smov %s2598_s24 }
 0x161   : > { %s3211_s18 = smov %s2587_s21  ;;  %16 = sbr.rel (!%p14_p2) target bundleno = 3 (0x3), region = 74 }
 0x166   :  { %1975 = vsyncpa [#allocation3], 1 }
 0x167   :  { %1977 = vsyncpa [#allocation3 + $0x1], 1 }

</bundles_post_ra>
